<compile_context>
chip_gen: v7x
topology: tpu7x:2x2x1
jax: 0.10.0
libtpu: 0.0.40
codegen_flags: <defaults>
</compile_context>

<pallas_src>
import math

import jax
import jax.numpy as jnp
import numpy as np
from jax import lax
from jax.experimental import pallas as pl
from jax.experimental.pallas import tpu as pltpu

LAYERS = 2
EMB = 32
N = 16
B = 16
EPS = 1e-12          # F.normalize default eps (applied to the L2 norm)
COLSUM_EPS = 1e-12   # zero-column guard for A.sum(axis=0)


def normalize_adjacency(adj):
    """Column-normalize a dense (B, N, N) adjacency.

    Hoisted out of the kernel: the adjacency is typically fixed across many
    forward calls, so callers can compute this once and pass
    a_is_normalized=True.
    """
    col_sum = jnp.sum(adj, axis=-2, keepdims=True)              # (B, 1, N)
    return adj / jnp.maximum(col_sum, COLSUM_EPS)


def _block_diag_transpose(a_norm):
    """Build A_blockdiag^T, shape (B*N, B*N), with EXACT zero off-diagonals.

    Uses dynamic_update_slice on a zeros buffer (no arithmetic masking), so no
    cross-graph leakage even if a block contained NaN/Inf.
    """
    b, n, _ = a_norm.shape
    a_t = jnp.swapaxes(a_norm, -1, -2)                          # per-graph A^T
    out = jnp.zeros((b * n, b * n), a_norm.dtype)
    for i in range(b):                                          # static unroll
        out = lax.dynamic_update_slice(out, a_t[i], (i * n, i * n))
    return out


def _itemconv_kernel(layers):
    def kernel(a_t_ref, xt_ref, w_ref, out_ref):
        # a_t_ref : (M, M)   A_blockdiag^T (column-normalized, transposed)
        # xt_ref  : (E, M)   feature-major activations (X^T), lane-dense
        # w_ref   : (L, E, E) nn.Linear weights (out, in), VMEM-resident
        # out_ref : (E, M)
        a_t = a_t_ref[...]
        xt = xt_ref[...]
        acc = xt                                     # layer-0 term
        for l in range(layers):                      # static unrolled loop
            w = w_ref[l]                             # (E_out, E_in), static idx
            # y = x @ W^T   <=>   y^T = W @ x^T  (no materialized transpose)
            xt = jnp.dot(w, xt, preferred_element_type=jnp.float32)     # (E, M)
            # z = A_bd @ y  <=>   z^T = y^T @ A_bd^T
            xt = jnp.dot(xt, a_t, preferred_element_type=jnp.float32)   # (E, M)
            # F.normalize(p=2, dim=-1): feature dim is axis 0 here.
            #   x / max(||x||, eps) == x * rsqrt(max(sum(x^2), eps^2))
            sumsq = jnp.sum(xt * xt, axis=0, keepdims=True)             # (1, M)
            xt = xt * lax.rsqrt(jnp.maximum(sumsq, EPS * EPS))
            acc = acc + xt
        out_ref[...] = acc * (1.0 / (layers + 1))

    return kernel


def item_conv_batched(adj, emb, weights, *, a_is_normalized=False):
    """B independent ItemConv forwards fused into one single-step pallas_call.

    adj:     (B, N, N) dense adjacency (densified scipy COO), or A_norm if
             a_is_normalized=True
    emb:     (B, N, E) item embeddings
    weights: (L, E, E) stacked nn.Linear weights, (out_features, in_features)
    returns: (B, N, E)
    """
    b, n, _ = adj.shape
    _, _, e = emb.shape
    l = weights.shape[0]
    m = b * n

    a_norm = adj if a_is_normalized else normalize_adjacency(adj)
    a_bd_t = _block_diag_transpose(a_norm)                      # (M, M)
    emb_t = emb.reshape(m, e).T                                 # (E, M) feature-major

    # Advisory cost hint: this kernel is tiny / dispatch-bound, let XLA
    # schedule surrounding ops around the custom call.
    flops = l * (2 * m * e * e + 2 * e * m * m + 4 * m * e) + 2 * m * e
    bytes_accessed = 4 * (m * m + 2 * m * e + l * e * e)
    cost = pl.CostEstimate(
        flops=flops, transcendentals=l * m, bytes_accessed=bytes_accessed
    )

    out_t = pl.pallas_call(
        _itemconv_kernel(l),
        out_shape=jax.ShapeDtypeStruct((e, m), jnp.float32),
        grid_spec=pltpu.PrefetchScalarGridSpec(
            num_scalar_prefetch=0,
            grid=(1,),
            in_specs=[
                pl.BlockSpec((m, m), lambda i: (0, 0)),
                pl.BlockSpec((e, m), lambda i: (0, 0)),
                pl.BlockSpec((l, e, e), lambda i: (0, 0, 0)),
            ],
            out_specs=pl.BlockSpec((e, m), lambda i: (0, 0)),
        ),
        compiler_params=pltpu.CompilerParams(
            dimension_semantics=("arbitrary",),
        ),
        cost_estimate=cost,
    )(a_bd_t, emb_t, weights)

    return out_t.T.reshape(b, n, e)


def item_conv(adj, emb, weights):
    """Single-graph forward matching ItemConv.forward(adjacency, embedding)."""
    return item_conv_batched(adj[None], emb[None], weights)[0]


def item_conv_ref(adj, emb, weights):
    """Pure-JAX reference reproducing the PyTorch forward exactly."""
    a = adj / jnp.sum(adj, axis=0, keepdims=True)
    x = emb
    acc = x
    for l in range(weights.shape[0]):
        x = x @ weights[l].T
        x = a @ x
        norm = jnp.sqrt(jnp.sum(x * x, axis=-1, keepdims=True))
        x = x / jnp.maximum(norm, EPS)
        acc = acc + x
    return acc / (weights.shape[0] + 1)


if __name__ == "__main__":
    key = jax.random.PRNGKey(0)
    k_adj, k_emb, k_w = jax.random.split(key, 3)

    # Batch of B independent graphs: positive dense adjacency (column sums > 0,
    # matching a densified scipy COO matrix) and item embeddings.
    adj = jax.random.uniform(
        k_adj, (B, N, N), dtype=jnp.float32, minval=0.1, maxval=1.0
    )
    emb = jax.random.normal(k_emb, (B, N, EMB), dtype=jnp.float32)

    # nn.Linear init: U(-1/sqrt(E), 1/sqrt(E)), shape (out_features, in_features).
    bound = 1.0 / math.sqrt(EMB)
    weights = jax.random.uniform(
        k_w, (LAYERS, EMB, EMB), dtype=jnp.float32, minval=-bound, maxval=bound
    )

    out = jax.block_until_ready(item_conv_batched(adj, emb, weights))

    ref = np.stack(
        [np.asarray(item_conv_ref(adj[i], emb[i], weights)) for i in range(B)]
    )
    np.testing.assert_allclose(np.asarray(out), ref, rtol=1e-5, atol=1e-5)

    # Single-graph path (the module's exact call signature) also works.
    out0 = jax.block_until_ready(item_conv(adj[0], emb[0], weights))
    np.testing.assert_allclose(np.asarray(out0), ref[0], rtol=1e-5, atol=1e-5)

    print("KERNEL_OK")
</pallas_src>

<mosaic_0001>
module attributes {stable_mosaic.version = 11 : i64} {
  func.func @kernel(%arg0: i32, %arg1: memref<256x256xf32, #tpu.memory_space<vmem>>, %arg2: memref<32x256xf32, #tpu.memory_space<vmem>>, %arg3: memref<2x32x32xf32, #tpu.memory_space<vmem>>, %arg4: memref<32x256xf32, #tpu.memory_space<vmem>>) attributes {dimension_semantics = [#tpu.dimension_semantics<arbitrary>], iteration_bounds = array<i64: 1>, scalar_prefetch = 0 : i64, scratch_operands = 0 : i64, tpu.core_type = #tpu.core_type<tc>, window_params = [{pipeline_mode = #tpu.pipeline_mode<synchronous>, transform_indices = @transform_0, window_bounds = array<i64: 256, 256>}, {pipeline_mode = #tpu.pipeline_mode<synchronous>, transform_indices = @transform_1, window_bounds = array<i64: 32, 256>}, {pipeline_mode = #tpu.pipeline_mode<synchronous>, transform_indices = @transform_2, window_bounds = array<i64: 2, 32, 32>}, {pipeline_mode = #tpu.pipeline_mode<synchronous>, transform_indices = @transform_3, window_bounds = array<i64: 32, 256>}]} {
    %c0 = arith.constant 0 : index
    %c0_0 = arith.constant 0 : index
    %0 = vector.load %arg1[%c0, %c0_0] : memref<256x256xf32, #tpu.memory_space<vmem>>, vector<256x256xf32>
    %c0_1 = arith.constant 0 : index
    %c0_2 = arith.constant 0 : index
    %1 = vector.load %arg2[%c0_1, %c0_2] : memref<32x256xf32, #tpu.memory_space<vmem>>, vector<32x256xf32>
    %c0_3 = arith.constant 0 : index
    %c0_4 = arith.constant 0 : index
    %c0_5 = arith.constant 0 : index
    %2 = vector.load %arg3[%c0_3, %c0_4, %c0_5] : memref<2x32x32xf32, #tpu.memory_space<vmem>>, vector<1x32x32xf32>
    %3 = vector.shape_cast %2 : vector<1x32x32xf32> to vector<32x32xf32>
    %cst = arith.constant dense<0.000000e+00> : vector<32x256xf32>
    %4 = tpu.matmul %3, %1, %cst {dimension_numbers = #tpu.dot_dimension_numbers<[1], [0], [0], [1], [0, 0, 1, 1], [], []>} : vector<32x32xf32>, vector<32x256xf32>, vector<32x256xf32> -> vector<32x256xf32>
    %cst_6 = arith.constant dense<0.000000e+00> : vector<32x256xf32>
    %5 = tpu.matmul %4, %0, %cst_6 {dimension_numbers = #tpu.dot_dimension_numbers<[1], [0], [0], [1], [0, 0, 1, 1], [], []>} : vector<32x256xf32>, vector<256x256xf32>, vector<32x256xf32> -> vector<32x256xf32>
    %6 = arith.mulf %5, %5 : vector<32x256xf32>
    %cst_7 = arith.constant dense<0.000000e+00> : vector<256xf32>
    %7 = vector.multi_reduction <add>, %6, %cst_7 [0] : vector<32x256xf32> to vector<256xf32>
    %8 = vector.shape_cast %7 : vector<256xf32> to vector<1x256xf32>
    %cst_8 = arith.constant 1.000000e-24 : f32
    %9 = vector.broadcast %cst_8 : f32 to vector<1x256xf32>
    %10 = arith.maximumf %8, %9 : vector<1x256xf32>
    %11 = math.rsqrt %10 : vector<1x256xf32>
    %12 = vector.broadcast %11 : vector<1x256xf32> to vector<32x256xf32>
    %13 = arith.mulf %5, %12 : vector<32x256xf32>
    %14 = arith.addf %1, %13 : vector<32x256xf32>
    %c1 = arith.constant 1 : index
    %c0_9 = arith.constant 0 : index
    %c0_10 = arith.constant 0 : index
    %15 = vector.load %arg3[%c1, %c0_9, %c0_10] : memref<2x32x32xf32, #tpu.memory_space<vmem>>, vector<1x32x32xf32>
    %16 = vector.shape_cast %15 : vector<1x32x32xf32> to vector<32x32xf32>
    %cst_11 = arith.constant dense<0.000000e+00> : vector<32x256xf32>
    %17 = tpu.matmul %16, %13, %cst_11 {dimension_numbers = #tpu.dot_dimension_numbers<[1], [0], [0], [1], [0, 0, 1, 1], [], []>} : vector<32x32xf32>, vector<32x256xf32>, vector<32x256xf32> -> vector<32x256xf32>
    %cst_12 = arith.constant dense<0.000000e+00> : vector<32x256xf32>
    %18 = tpu.matmul %17, %0, %cst_12 {dimension_numbers = #tpu.dot_dimension_numbers<[1], [0], [0], [1], [0, 0, 1, 1], [], []>} : vector<32x256xf32>, vector<256x256xf32>, vector<32x256xf32> -> vector<32x256xf32>
    %19 = arith.mulf %18, %18 : vector<32x256xf32>
    %cst_13 = arith.constant dense<0.000000e+00> : vector<256xf32>
    %20 = vector.multi_reduction <add>, %19, %cst_13 [0] : vector<32x256xf32> to vector<256xf32>
    %21 = vector.shape_cast %20 : vector<256xf32> to vector<1x256xf32>
    %cst_14 = arith.constant 1.000000e-24 : f32
    %22 = vector.broadcast %cst_14 : f32 to vector<1x256xf32>
    %23 = arith.maximumf %21, %22 : vector<1x256xf32>
    %24 = math.rsqrt %23 : vector<1x256xf32>
    %25 = vector.broadcast %24 : vector<1x256xf32> to vector<32x256xf32>
    %26 = arith.mulf %18, %25 : vector<32x256xf32>
    %27 = arith.addf %14, %26 : vector<32x256xf32>
    %cst_15 = arith.constant 0.333333343 : f32
    %28 = vector.broadcast %cst_15 : f32 to vector<32x256xf32>
    %29 = arith.mulf %27, %28 : vector<32x256xf32>
    %c0_16 = arith.constant 0 : index
    %c0_17 = arith.constant 0 : index
    %30 = vector.load %arg4[%c0_16, %c0_17] : memref<32x256xf32, #tpu.memory_space<vmem>>, vector<32x256xf32>
    tpu.vector_store %arg4[%c0_16, %c0_17], %29 {strides = array<i32>} : memref<32x256xf32, #tpu.memory_space<vmem>>, vector<32x256xf32>,
    return
  }
  func.func @transform_0(%arg0: i32) -> (i32, i32) {
    %c0_i32 = arith.constant 0 : i32
    %c0_i32_0 = arith.constant 0 : i32
    %c0_i32_1 = arith.constant 0 : i32
    return %c0_i32, %c0_i32_0 : i32, i32
  }
  func.func @transform_1(%arg0: i32) -> (i32, i32) {
    %c0_i32 = arith.constant 0 : i32
    %c0_i32_0 = arith.constant 0 : i32
    %c0_i32_1 = arith.constant 0 : i32
    return %c0_i32, %c0_i32_0 : i32, i32
  }
  func.func @transform_2(%arg0: i32) -> (i32, i32, i32) {
    %c0_i32 = arith.constant 0 : i32
    %c0_i32_0 = arith.constant 0 : i32
    %c0_i32_1 = arith.constant 0 : i32
    %c0_i32_2 = arith.constant 0 : i32
    return %c0_i32, %c0_i32_0, %c0_i32_1 : i32, i32, i32
  }
  func.func @transform_3(%arg0: i32) -> (i32, i32) {
    %c0_i32 = arith.constant 0 : i32
    %c0_i32_0 = arith.constant 0 : i32
    %c0_i32_1 = arith.constant 0 : i32
    return %c0_i32, %c0_i32_0 : i32, i32
  }
}

</mosaic_0001>

<bundles_post_ra>
// kernel: tpu_custom_call.1
= control target key start
LH: loop header
LB: loop body
LE: loop exit
PB: predicated region body
PF: predicated region fallthrough
CT: control target
= control target key end

     0   :  { %8 = vsyncpa [#allocation3], 0  ;;  %s1208_s0 = inlined_call_operand.hbm [shape: f32[256,256], index: 0, kind: input, shape index: {}]   ;;  %s1209_s1 = inlined_call_operand.hbm [shape: f32[32,256], index: 1, kind: input, shape index: {}]   ;;  %s1210_s2 = inlined_call_operand.hbm [shape: f32[2,32,32], index: 2, kind: input, shape index: {}]   ;;  %s1211_s3 = inlined_call_operand.hbm [shape: f32[32,256], index: 3, kind: output, shape index: {}]  }
   0x1   :  { %9 = vsyncpa [#allocation6], 0 }
   0x2   :  { %10 = vsyncpa [#allocation4], 0  ;;  %s907_s12 = smov [#allocation5]   ;;  %s908_s14 = smov [#allocation2]  }
   0x3   :  { %s28_s13 = sshll.u32 %s907_s12, 4  ;;  %s16_s15 = sshll.u32 %s908_s14, 4  ;;  %s29_s13 = int_to_ptr.vmem [resolvable:$true] %s28_s13  ;;  %s936_s15 = int_to_ptr.vmem [resolvable:$true] %s16_s15 }
   0x4   :  { %s813_s18 = scalar_lea.hbm %s1209_s1, 1024 }
   0x5   :  { %p814_p0 = scmp.ne.s32.totalorder %s1209_s1, %s813_s18  ;;  %p817_p1 = scmp.lt.u32.totalorder %s813_s18, %s1209_s1 }
   0x7   :  { %p819_p2 = pnand %p817_p1, %p814_p0 }
   0x9   :  { %822 = shalt.err (!%p819_p2)
}
   0xa   :  { %s823_s23 = scalar_lea.vmem %s29_s13, 1024  ;;  %p828_p4 = scmp.lt.s32.totalorder %s29_s13, %s29_s13 }
   0xb   :  { %p824_p3 = scmp.ne.s32.totalorder %s29_s13, %s823_s23  ;;  %p829_p5 = scmp.lt.s32.totalorder %s823_s23, %s823_s23 }
   0xd   :  { %p830_p6 = por %p829_p5, %p828_p4 }
   0xf   :  { %p831_p7 = pnand %p830_p6, %p824_p3 }
  0x11   :  { %834 = shalt.err (!%p831_p7)
}
  0x12   :  { %s909_s24 = smov 256   ;;  %s910_s25 = smov 16  }
  0x13   :  { %34 = dma.hbm_to_vmem [thread:$0]  %s1209_s1, 1024, %s29_s13, [#allocation6], %s909_s24, %s909_s24, %s910_s25  }
  0x14   :  { %s835_s30 = scalar_lea.hbm %s1208_s0, 8192 }
  0x15   :  { %p836_p8 = scmp.ne.s32.totalorder %s1208_s0, %s835_s30  ;;  %p839_p9 = scmp.lt.u32.totalorder %s835_s30, %s1208_s0 }
  0x17   :  { %p841_p10 = pnand %p839_p9, %p836_p8 }
  0x19   :  { %844 = shalt.err (!%p841_p10)
}
  0x1a   :  { %s845_s8 = scalar_lea.vmem %s936_s15, 8192  ;;  %p850_p12 = scmp.lt.s32.totalorder %s936_s15, %s936_s15 }
  0x1b   :  { %p846_p11 = scmp.ne.s32.totalorder %s936_s15, %s845_s8  ;;  %p851_p13 = scmp.lt.s32.totalorder %s845_s8, %s845_s8 }
  0x1d   :  { %p852_p0 = por %p851_p13, %p850_p12 }
  0x1f   :  { %p853_p1 = pnand %p852_p0, %p846_p11 }
  0x21   :  { %856 = shalt.err (!%p853_p1)
}
  0x22   :  { %22 = dma.hbm_to_vmem [thread:$0]  %s1208_s0, 8192, %s936_s15, [#allocation3], %s909_s24, %s909_s24, %s910_s25  }
  0x23   :  { %s911_s10 = smov [#allocation7]   ;;  %s857_s14 = scalar_lea.hbm %s1210_s2, 1024 }
  0x24   :  { %s40_s11 = sshll.u32 %s911_s10, 4  ;;  %p858_p2 = scmp.ne.s32.totalorder %s1210_s2, %s857_s14  ;;  %s41_s11 = int_to_ptr.vmem [resolvable:$true] %s40_s11 }
  0x25   :  { %p861_p3 = scmp.lt.u32.totalorder %s857_s14, %s1210_s2 }
  0x27   :  { %p863_p4 = pnand %p861_p3, %p858_p2 }
  0x29   :  { %866 = shalt.err (!%p863_p4)
}
  0x2a   :  { %s867_s20 = scalar_lea.vmem %s41_s11, 1024  ;;  %p872_p6 = scmp.lt.s32.totalorder %s41_s11, %s41_s11 }
  0x2b   :  { %p868_p5 = scmp.ne.s32.totalorder %s41_s11, %s867_s20  ;;  %p873_p7 = scmp.lt.s32.totalorder %s867_s20, %s867_s20 }
  0x2d   :  { %p874_p8 = por %p873_p7, %p872_p6 }
  0x2f   :  { %p875_p9 = pnand %p874_p8, %p868_p5 }
  0x31   :  { %878 = shalt.err (!%p875_p9)
}
  0x32   :  { %s912_s0 = smov 128   ;;  %s913_s15 = smov 8  }
  0x33   :  { %46 = dma.hbm_to_vmem [thread:$0]  %s1210_s2, 1024, %s41_s11, [#allocation6], %s912_s0, %s912_s0, %s913_s15  }
  0x34   :  { %901 = dma.done.wait [#allocation3], 8192  }
  0x35   :  { %902 = vsyncadd [#allocation3], 4294959104 }
  0x36   :  { %903 = dma.done.wait [#allocation6], 2048  }
  0x37   :  { %904 = vsyncadd [#allocation6], 4294965248  ;;  %v1212_v0 = vmov 0.0   ;;  %v987_v1 = vld [vmem:[#allocation5 + $0x8] sm:$0xff]  ;;  %v989_v2 = vld [vmem:[#allocation5 + $0x18] sm:$0xff]  ;;  %vm132_vm0 = vcmask 261120  }
  0x38   :  { %209 = vmatprep.mubr.f32.mxu1 %v1212_v0  ;;  %450 = vmatprep.mubr.f32.mxu0 %v1212_v0  ;;  %1220 = vst [vmem:[#allocation12_spill] sm:$0xff] %v987_v1  ;;  %1221 = vst [vmem:[#allocation13_spill] sm:$0xff] %v989_v2  ;;  %v991_v3 = vld [vmem:[#allocation5] sm:$0xff]  ;;  %v652_v4 = vpack.c.bf16 %v989_v2, %v987_v1  ;;  %v995_v5 = vld [vmem:[#allocation5 + $0x10] sm:$0xff]  ;;  %s915_s2 = smov [#allocation8]  }
  0x39   :  { %1222 = vst [vmem:[#allocation14_spill] sm:$0xff] %v991_v3  ;;  %1223 = vst [vmem:[#allocation15_spill] sm:$0xff] %v995_v5  ;;  %v997_v6 = vld [vmem:[#allocation5 + $0x28] sm:$0xff]  ;;  %v999_v7 = vld [vmem:[#allocation5 + $0x38] sm:$0xff]  ;;  %v654_v8 = vpack.c.bf16 %v995_v5, %v991_v3  ;;  %s631_s23 = sshll.u32 %s915_s2, 4  ;;  %s632_s23 = int_to_ptr.vmem [resolvable:$true] %s631_s23 }
  0x3a   :  { %1224 = vst [vmem:[#allocation16_spill] sm:$0xff] %v997_v6  ;;  %1225 = vst [vmem:[#allocation17_spill] sm:$0xff] %v999_v7  ;;  %v656_v9 = vpack.c.bf16 %v999_v7, %v997_v6  ;;  %v1005_v10 = vld [vmem:[#allocation5 + $0x20] sm:$0xff]  ;;  %v1007_v11 = vld [vmem:[#allocation5 + $0x30] sm:$0xff]  ;;  %653 = vmatprep.subr.bf16.mxu1 %v652_v4  ;;  %s879_s26 = scalar_lea.vmem %s632_s23, 1024  ;;  %p884_p11 = scmp.lt.s32.totalorder %s632_s23, %s632_s23 }
  0x3b   :  { %655 = vmatpush1.bf16.msra.mxu1 %v654_v8  ;;  %v658_v12 = vpack.c.bf16 %v1007_v11, %v1005_v10  ;;  %v57_v13 = vld [vmem:[#allocation2 + $0x8] sm:$0xff]  ;;  %v59_v14 = vld [vmem:[#allocation2 + $0x18] sm:$0xff]  ;;  %v56_v16 = vld [vmem:[#allocation2] sm:$0xff]  ;;  %p880_p10 = scmp.ne.s32.totalorder %s632_s23, %s879_s26  ;;  %p885_p12 = scmp.lt.s32.totalorder %s879_s26, %s879_s26 }
  0x3c   :  { %657 = vmatprep.subr.bf16.mxu1 %v656_v9  ;;  %v1011_v15 = vpack.c.bf16 %v59_v14, %v57_v13  ;;  %v58_v17 = vld [vmem:[#allocation2 + $0x10] sm:$0xff]  ;;  %v61_v18 = vld [vmem:[#allocation2 + $0x28] sm:$0xff]  ;;  %v63_v19 = vld [vmem:[#allocation2 + $0x38] sm:$0xff] }
  0x3d   :  { %v128_v20 = vld [vmem:[#allocation7] sm:$0xff]  ;;  %v1013_v21 = vpack.c.bf16 %v58_v17, %v56_v16  ;;  %v1016_v22 = vpack.c.bf16 %v63_v19, %v61_v18  ;;  %v62_v24 = vld [vmem:[#allocation2 + $0x30] sm:$0xff]  ;;  %v65_v25 = vld [vmem:[#allocation2 + $0x48] sm:$0xff]  ;;  %p886_p13 = por %p885_p12, %p884_p11 }
  0x3e   :  { %v60_v23 = vld [vmem:[#allocation2 + $0x20] sm:$0xff]  ;;  %v67_v26 = vld [vmem:[#allocation2 + $0x58] sm:$0xff]  ;;  %v129_v27 = vld [vmem:[#allocation7 + $0x8] sm:$0xff] }
  0x3f   :  { %659 = vmatpush1.bf16.msra.mxu1 %v658_v12  ;;  %v1021_v28 = vpack.c.bf16 %v62_v24, %v60_v23  ;;  %v1024_v29 = vpack.c.bf16 %v67_v26, %v65_v25  ;;  %v64_v30 = vld [vmem:[#allocation2 + $0x40] sm:$0xff]  ;;  %v66_v31 = vld [vmem:[#allocation2 + $0x50] sm:$0xff]  ;;  %v69_v32 = vld [vmem:[#allocation2 + $0x68] sm:$0xff]  ;;  %p887_p0 = pnand %p886_p13, %p880_p10 }
  0x40   :  { %661 = vmatprep.subr.bf16.mxu1 %v1011_v15  ;;  %v71_v33 = vld [vmem:[#allocation2 + $0x78] sm:$0xff]  ;;  %v130_v34 = vld [vmem:[#allocation7 + $0x10] sm:$0xff]  ;;  %v1029_v35 = vpack.c.bf16 %v66_v31, %v64_v30  ;;  %v68_v37 = vld [vmem:[#allocation2 + $0x60] sm:$0xff] }
  0x41   :  { %v1032_v36 = vpack.c.bf16 %v71_v33, %v69_v32  ;;  %v70_v38 = vld [vmem:[#allocation2 + $0x70] sm:$0xff]  ;;  %v73_v39 = vld [vmem:[#allocation2 + $0x88] sm:$0xff]  ;;  %v75_v40 = vld [vmem:[#allocation2 + $0x98] sm:$0xff] }
  0x42   :  { %644 = vmatmul.mubr.msk.f32.vlgmr.msra.gmra.mrb[0].mxu1 %vm132_vm0, %v128_v20  ;;  %v131_v41 = vld [vmem:[#allocation7 + $0x18] sm:$0xff]  ;;  %v1037_v42 = vpack.c.bf16 %v70_v38, %v68_v37  ;;  %v1040_v43 = vpack.c.bf16 %v75_v40, %v73_v39  ;;  %v72_v44 = vld [vmem:[#allocation2 + $0x80] sm:$0xff]  ;;  %v74_v45 = vld [vmem:[#allocation2 + $0x90] sm:$0xff] }
  0x43   :  { %215 = vmatprep.mubr.f32.mxu1 %v1212_v0  ;;  %663 = vmatpush1.bf16.msra.mxu1 %v1013_v21  ;;  %v77_v46 = vld [vmem:[#allocation2 + $0xa8] sm:$0xff]  ;;  %v79_v47 = vld [vmem:[#allocation2 + $0xb8] sm:$0xff]  ;;  %v1044_v48 = vpack.c.bf16 %v74_v45, %v72_v44  ;;  %v76_v50 = vld [vmem:[#allocation2 + $0xa0] sm:$0xff] }
  0x44   :  { %665 = vmatprep.subr.bf16.mxu1 %v1016_v22  ;;  %v1047_v49 = vpack.c.bf16 %v79_v47, %v77_v46  ;;  %v78_v51 = vld [vmem:[#allocation2 + $0xb0] sm:$0xff]  ;;  %v81_v52 = vld [vmem:[#allocation2 + $0xc8] sm:$0xff]  ;;  %v83_v53 = vld [vmem:[#allocation2 + $0xd8] sm:$0xff] }
  0x45   :  { %v1050_v54 = vpack.c.bf16 %v78_v51, %v76_v50  ;;  %v1053_v55 = vpack.c.bf16 %v83_v53, %v81_v52  ;;  %v80_v56 = vld [vmem:[#allocation2 + $0xc0] sm:$0xff]  ;;  %v82_v57 = vld [vmem:[#allocation2 + $0xd0] sm:$0xff]  ;;  %v85_v58 = vld [vmem:[#allocation2 + $0xe8] sm:$0xff] }
  0x46   :  { %645 = vmatmul.mubr.msk.f32.gmra.mrb[2].mxu1 %vm132_vm0, %v129_v27  ;;  %v87_v59 = vld [vmem:[#allocation2 + $0xf8] sm:$0xff]  ;;  %v1056_v60 = vpack.c.bf16 %v82_v57, %v80_v56  ;;  %v84_v62 = vld [vmem:[#allocation2 + $0xe0] sm:$0xff]  ;;  %v86_v63 = vld [vmem:[#allocation2 + $0xf0] sm:$0xff] }
  0x47   :  { %221 = vmatprep.mubr.f32.mxu1 %v1212_v0  ;;  %667 = vmatpush1.bf16.msra.mxu1 %v1021_v28  ;;  %v1059_v61 = vpack.c.bf16 %v87_v59, %v85_v58  ;;  %v89_v4 = vld [vmem:[#allocation2 + $0x108] sm:$0xff]  ;;  %v91_v8 = vld [vmem:[#allocation2 + $0x118] sm:$0xff]  ;;  %v1062_v9 = vpack.c.bf16 %v86_v63, %v84_v62  ;;  %v88_v13 = vld [vmem:[#allocation2 + $0x100] sm:$0xff] }
  0x48   :  { %669 = vmatprep.subr.bf16.mxu1 %v1024_v29  ;;  %v1065_v12 = vpack.c.bf16 %v91_v8, %v89_v4  ;;  %v90_v14 = vld [vmem:[#allocation2 + $0x110] sm:$0xff]  ;;  %v93_v16 = vld [vmem:[#allocation2 + $0x128] sm:$0xff]  ;;  %v95_v17 = vld [vmem:[#allocation2 + $0x138] sm:$0xff] }
  0x49   :  { %v1068_v18 = vpack.c.bf16 %v90_v14, %v88_v13  ;;  %v1071_v19 = vpack.c.bf16 %v95_v17, %v93_v16  ;;  %v92_v20 = vld [vmem:[#allocation2 + $0x120] sm:$0xff]  ;;  %v94_v23 = vld [vmem:[#allocation2 + $0x130] sm:$0xff]  ;;  %v97_v24 = vld [vmem:[#allocation2 + $0x148] sm:$0xff] }
  0x4a   :  { %646 = vmatmul.mubr.msk.f32.gmra.mrb[4].mxu1 %vm132_vm0, %v130_v34  ;;  %v99_v25 = vld [vmem:[#allocation2 + $0x158] sm:$0xff]  ;;  %v1074_v26 = vpack.c.bf16 %v94_v23, %v92_v20  ;;  %v96_v30 = vld [vmem:[#allocation2 + $0x140] sm:$0xff]  ;;  %v98_v31 = vld [vmem:[#allocation2 + $0x150] sm:$0xff] }
  0x4b   :  { %227 = vmatprep.mubr.f32.mxu1 %v1212_v0  ;;  %671 = vmatpush1.bf16.msra.mxu1 %v1029_v35  ;;  %v1077_v27 = vpack.c.bf16 %v99_v25, %v97_v24  ;;  %v101_v32 = vld [vmem:[#allocation2 + $0x168] sm:$0xff]  ;;  %v103_v33 = vld [vmem:[#allocation2 + $0x178] sm:$0xff]  ;;  %v1080_v34 = vpack.c.bf16 %v98_v31, %v96_v30  ;;  %v100_v38 = vld [vmem:[#allocation2 + $0x160] sm:$0xff] }
  0x4c   :  { %673 = vmatprep.subr.bf16.mxu1 %v1032_v36  ;;  %v1083_v37 = vpack.c.bf16 %v103_v33, %v101_v32  ;;  %v102_v39 = vld [vmem:[#allocation2 + $0x170] sm:$0xff]  ;;  %v105_v40 = vld [vmem:[#allocation2 + $0x188] sm:$0xff]  ;;  %v104_v46 = vld [vmem:[#allocation2 + $0x180] sm:$0xff] }
  0x4d   :  { %v1086_v44 = vpack.c.bf16 %v102_v39, %v100_v38  ;;  %v106_v47 = vld [vmem:[#allocation2 + $0x190] sm:$0xff]  ;;  %v109_v50 = vld [vmem:[#allocation2 + $0x1a8] sm:$0xff]  ;;  %v111_v51 = vld [vmem:[#allocation2 + $0x1b8] sm:$0xff] }
  0x4e   :  { %647 = vmatmul.mubr.msk.f32.gmra.mrb[6].mxu1 %vm132_vm0, %v131_v41  ;;  %v107_v41 = vld [vmem:[#allocation2 + $0x198] sm:$0xff]  ;;  %v1092_v52 = vpack.c.bf16 %v106_v47, %v104_v46  ;;  %v1095_v53 = vpack.c.bf16 %v111_v51, %v109_v50  ;;  %v108_v56 = vld [vmem:[#allocation2 + $0x1a0] sm:$0xff]  ;;  %v110_v57 = vld [vmem:[#allocation2 + $0x1b0] sm:$0xff] }
  0x4f   :  { %675 = vmatpush1.bf16.msra.mxu1 %v1037_v42  ;;  %v1089_v45 = vpack.c.bf16 %v107_v41, %v105_v40  ;;  %v113_v58 = vld [vmem:[#allocation2 + $0x1c8] sm:$0xff]  ;;  %v115_v59 = vld [vmem:[#allocation2 + $0x1d8] sm:$0xff]  ;;  %v1098_v62 = vpack.c.bf16 %v110_v57, %v108_v56  ;;  %v112_v4 = vld [vmem:[#allocation2 + $0x1c0] sm:$0xff] }
  0x50   :  { %677 = vmatprep.subr.bf16.mxu1 %v1040_v43  ;;  %v1101_v63 = vpack.c.bf16 %v115_v59, %v113_v58  ;;  %v114_v8 = vld [vmem:[#allocation2 + $0x1d0] sm:$0xff]  ;;  %v117_v13 = vld [vmem:[#allocation2 + $0x1e8] sm:$0xff]  ;;  %v119_v14 = vld [vmem:[#allocation2 + $0x1f8] sm:$0xff] }
  0x51   :  { %v1104_v16 = vpack.c.bf16 %v114_v8, %v112_v4  ;;  %v1107_v17 = vpack.c.bf16 %v119_v14, %v117_v13  ;;  %v116_v20 = vld [vmem:[#allocation2 + $0x1e0] sm:$0xff]  ;;  %v118_v23 = vld [vmem:[#allocation2 + $0x1f0] sm:$0xff] }
  0x52   :  { %v1111_v24 = vpack.c.bf16 %v118_v23, %v116_v20 }
  0x53   :  { %679 = vmatpush1.bf16.msra.mxu1 %v1044_v48 }
  0x54   :  { %681 = vmatprep.subr.bf16.mxu1 %v1047_v49 }
  0x57   :  { %683 = vmatpush1.bf16.msra.mxu1 %v1050_v54 }
  0x58   :  { %685 = vmatprep.subr.bf16.mxu1 %v1053_v55 }
  0x5b   :  { %687 = vmatpush1.bf16.msra.mxu1 %v1056_v60 }
  0x5c   :  { %689 = vmatprep.subr.bf16.mxu1 %v1059_v61 }
  0x5f   :  { %691 = vmatpush1.bf16.msra.mxu1 %v1062_v9 }
  0x60   :  { %693 = vmatprep.subr.bf16.mxu1 %v1065_v12 }
  0x63   :  { %695 = vmatpush1.bf16.msra.mxu1 %v1068_v18 }
  0x64   :  { %697 = vmatprep.subr.bf16.mxu1 %v1071_v19 }
  0x67   :  { %699 = vmatpush1.bf16.msra.mxu1 %v1074_v26 }
  0x68   :  { %701 = vmatprep.subr.bf16.mxu1 %v1077_v27 }
  0x6b   :  { %703 = vmatpush1.bf16.msra.mxu1 %v1080_v34 }
  0x6c   :  { %705 = vmatprep.subr.bf16.mxu1 %v1083_v37 }
  0x6f   :  { %707 = vmatpush1.bf16.msra.mxu1 %v1086_v44 }
  0x70   :  { %709 = vmatprep.subr.bf16.mxu1 %v1089_v45 }
  0x73   :  { %711 = vmatpush1.bf16.msra.mxu1 %v1092_v52 }
  0x74   :  { %713 = vmatprep.subr.bf16.mxu1 %v1095_v53 }
  0x77   :  { %715 = vmatpush1.bf16.msra.mxu1 %v1098_v62 }
  0x78   :  { %717 = vmatprep.subr.bf16.mxu1 %v1101_v63 }
  0x7b   :  { %719 = vmatpush1.bf16.msra.mxu1 %v1104_v16 }
  0x7c   :  { %721 = vmatprep.subr.bf16.mxu1 %v1107_v17 }
  0x7f   :  { %723 = vmatpush1.bf16.msra.mxu1 %v1111_v24 }
 0x115   :  { %v211_v25 = vpop.f32.mrb[0].mxu1 }
 0x116   :  { %v213_v30 = vpop.f32.mrb[1].mxu1 }
 0x117   :  { %298 = vmatprep.mubr.f32.mxu1 %v213_v30 }
 0x118   :  { %299 = vmatmul.mubr.f32.vlgmr.msra.gmra.mrb[8].mxu1 %v211_v25 }
 0x119   :  { %v217_v31 = vpop.f32.mrb[2].mxu1 }
 0x11a   :  { %v219_v32 = vpop.f32.mrb[3].mxu1 }
 0x11b   :  { %304 = vmatprep.mubr.f32.mxu1 %v219_v32 }
 0x11c   :  { %305 = vmatmul.mubr.f32.gmra.mrb[10].mxu1 %v217_v31 }
 0x11d   :  { %v223_v33 = vpop.f32.mrb[4].mxu1 }
 0x11e   :  { %v225_v38 = vpop.f32.mrb[5].mxu1 }
 0x11f   :  { %310 = vmatprep.mubr.f32.mxu1 %v225_v38 }
 0x120   :  { %311 = vmatmul.mubr.f32.gmra.mrb[12].mxu1 %v223_v33 }
 0x121   :  { %v229_v39 = vpop.f32.mrb[6].mxu1 }
 0x122   :  { %v231_v40 = vpop.f32.mrb[7].mxu1 }
 0x123   :  { %316 = vmatprep.mubr.f32.mxu1 %v231_v40 }
 0x124   :  { %317 = vmatmul.mubr.f32.gmra.mrb[14].mxu1 %v229_v39 }
 0x1eb   :  { %v300_v41 = vpop.f32.mrb[8].mxu1 }
 0x1ec   :  { %v302_v46 = vpop.f32.mrb[9].mxu1  ;;  %v323_v50 = vmul.f32 %v300_v41, %v300_v41 }
 0x1ed   :  { %v324_v57 = vmul.f32 %v302_v46, %v302_v46 }
 0x1ef   :  { %v306_v47 = vpop.f32.mrb[10].mxu1 }
 0x1f0   :  { %v325_v51 = vmul.f32 %v306_v47, %v306_v47  ;;  %v308_v56 = vpop.f32.mrb[11].mxu1 }
 0x1f1   :  { %v326_v58 = vmul.f32 %v308_v56, %v308_v56 }
 0x1f2   :  { %v331_v59 = vadd.f32 %v325_v51, %v323_v50 }
 0x1f3   :  { %v340_v4 = vadd.f32 %v326_v58, %v324_v57  ;;  %v312_v8 = vpop.f32.mrb[12].mxu1 }
 0x1f4   :  { %v327_v13 = vmul.f32 %v312_v8, %v312_v8  ;;  %v314_v14 = vpop.f32.mrb[13].mxu1 }
 0x1f5   :  { %v328_v20 = vmul.f32 %v314_v14, %v314_v14 }
 0x1f6   :  { %v332_v23 = vadd.f32 %v331_v59, %v327_v13 }
 0x1f7   :  { %v341_v25 = vadd.f32 %v340_v4, %v328_v20  ;;  %v318_v30 = vpop.f32.mrb[14].mxu1 }
 0x1f8   :  { %v329_v31 = vmul.f32 %v318_v30, %v318_v30  ;;  %v320_v32 = vpop.f32.mrb[15].mxu1 }
 0x1f9   :  { %v330_v33 = vmul.f32 %v320_v32, %v320_v32 }
 0x1fa   :  { %v333_v38 = vadd.f32 %v332_v23, %v329_v31 }
 0x1fb   :  { %v342_v39 = vadd.f32 %v341_v25, %v330_v33 }
 0x1fc   :  { %v334_v40 = vrot.slane %v333_v38, 4 }
 0x1fd   :  { %v343_v0 = vrot.slane %v342_v39, 4 }
 0x1fe   :  { %v335_v5 = vadd.f32 %v334_v40, %v333_v38 }
 0x1ff   :  { %v344_v2 = vadd.f32 %v343_v0, %v342_v39 }
 0x200   :  { %v336_v1 = vrot.slane %v335_v5, 2 }
 0x201   :  { %v345_v7 = vrot.slane %v344_v2, 2 }
 0x202   :  { %v337_v50 = vadd.f32 %v336_v1, %v335_v5 }
 0x203   :  { %v346_v51 = vadd.f32 %v345_v7, %v344_v2 }
 0x204   :  { %v338_v57 = vrot.slane %v337_v50, 1 }
 0x205   :  { %v347_v58 = vrot.slane %v346_v51, 1 }
 0x206   :  { %v339_v3 = vadd.f32 %v338_v57, %v337_v50 }
 0x207   :  { %v348_v6 = vadd.f32 %v347_v58, %v346_v51 }
 0x208   :  { %v349_v59 = vmax.f32 %v339_v3, 1e-24 }
 0x209   :  { %v350_v4 = vmax.f32 %v348_v6, 1e-24 }
 0x20a   :  { %805 = vrsqrt.f32 %v349_v59 }
 0x20b   :  { %807 = vrsqrt.f32 %v350_v4 }
 0x214   :  { %v806_v13 = vpop.eup %805 }
 0x215   :  { %v808_v20 = vpop.eup %807  ;;  %v1114_v23 = vmul.f32 %v806_v13, %v312_v8  ;;  %v1116_v25 = vmul.f32 %v806_v13, %v318_v30  ;;  %v1118_v31 = vmul.f32 %v806_v13, %v300_v41  ;;  %v1120_v0 = vmul.f32 %v806_v13, %v306_v47  ;;  %v371_v8 = vld [vmem:[#allocation7 + $0x28] sm:$0xff] }
 0x216   :  { %v1122_v1 = vmul.f32 %v808_v20, %v314_v14  ;;  %v1124_v2 = vmul.f32 %v808_v20, %v320_v32  ;;  %v1126_v5 = vmul.f32 %v808_v20, %v302_v46  ;;  %v1128_v3 = vmul.f32 %v808_v20, %v308_v56  ;;  %v370_v46 = vld [vmem:[#allocation7 + $0x20] sm:$0xff]  ;;  %v372_v14 = vld [vmem:[#allocation7 + $0x30] sm:$0xff] }
 0x217   :  { %v730_v6 = vpack.c.bf16 %v1116_v25, %v1114_v23  ;;  %v726_v47 = vpack.c.bf16 %v1120_v0, %v1118_v31  ;;  %v1226_v56 = vmov 0.0   ;;  %v365_v20 = vadd.f32 %v1114_v23, %v1005_v10  ;;  %v1232_v10 = vld [vmem:[#allocation15_spill] sm:$0xff] }
 0x218   :  { %v728_v7 = vpack.c.bf16 %v1124_v2, %v1122_v1  ;;  %v724_v41 = vpack.c.bf16 %v1128_v3, %v1126_v5  ;;  %v363_v23 = vadd.f32 %v1120_v0, %v1232_v10 }
 0x21a   :  { %725 = vmatprep.subr.bf16.mxu0 %v724_v41 }
 0x21b   :  { %727 = vmatpush1.bf16.msra.mxu0 %v726_v47  ;;  %v1228_v47 = vld [vmem:[#allocation14_spill] sm:$0xff] }
 0x21c   :  { %729 = vmatprep.subr.bf16.mxu0 %v728_v7  ;;  %v1227_v7 = vld [vmem:[#allocation16_spill] sm:$0xff] }
 0x21d   :  { %v366_v41 = vadd.f32 %v1122_v1, %v1227_v7 }
 0x21f   :  { %731 = vmatpush1.bf16.msra.mxu0 %v730_v6  ;;  %v367_v6 = vadd.f32 %v1116_v25, %v1007_v11 }
 0x220   :  { %733 = vmatprep.subr.bf16.mxu0 %v1011_v15  ;;  %v373_v15 = vld [vmem:[#allocation7 + $0x38] sm:$0xff] }
 0x222   :  { %648 = vmatmul.mubr.msk.f32.vlgmr.msra.gmra.mrb[0].mxu0 %vm132_vm0, %v370_v46  ;;  %v361_v46 = vadd.f32 %v1118_v31, %v1228_v47 }
 0x223   :  { %456 = vmatprep.mubr.f32.mxu0 %v1226_v56  ;;  %735 = vmatpush1.bf16.msra.mxu0 %v1013_v21 }
 0x224   :  { %737 = vmatprep.subr.bf16.mxu0 %v1016_v22 }
 0x226   :  { %649 = vmatmul.mubr.msk.f32.gmra.mrb[2].mxu0 %vm132_vm0, %v371_v8  ;;  %v1229_v8 = vld [vmem:[#allocation17_spill] sm:$0xff] }
 0x227   :  { %462 = vmatprep.mubr.f32.mxu0 %v1226_v56  ;;  %739 = vmatpush1.bf16.msra.mxu0 %v1021_v28 }
 0x228   :  { %741 = vmatprep.subr.bf16.mxu0 %v1024_v29 }
 0x22a   :  { %650 = vmatmul.mubr.msk.f32.gmra.mrb[4].mxu0 %vm132_vm0, %v372_v14  ;;  %v368_v14 = vadd.f32 %v1124_v2, %v1229_v8 }
 0x22b   :  { %468 = vmatprep.mubr.f32.mxu0 %v1226_v56  ;;  %743 = vmatpush1.bf16.msra.mxu0 %v1029_v35 }
 0x22c   :  { %745 = vmatprep.subr.bf16.mxu0 %v1032_v36 }
 0x22e   :  { %651 = vmatmul.mubr.msk.f32.gmra.mrb[6].mxu0 %vm132_vm0, %v373_v15  ;;  %v1230_v15 = vld [vmem:[#allocation12_spill] sm:$0xff] }
 0x22f   :  { %747 = vmatpush1.bf16.msra.mxu0 %v1037_v42 }
 0x230   :  { %749 = vmatprep.subr.bf16.mxu0 %v1040_v43 }
 0x233   :  { %751 = vmatpush1.bf16.msra.mxu0 %v1044_v48 }
 0x234   :  { %753 = vmatprep.subr.bf16.mxu0 %v1047_v49 }
 0x237   :  { %755 = vmatpush1.bf16.msra.mxu0 %v1050_v54 }
 0x238   :  { %757 = vmatprep.subr.bf16.mxu0 %v1053_v55 }
 0x23b   :  { %759 = vmatpush1.bf16.msra.mxu0 %v1056_v60 }
 0x23c   :  { %761 = vmatprep.subr.bf16.mxu0 %v1059_v61 }
 0x23f   :  { %763 = vmatpush1.bf16.msra.mxu0 %v1062_v9 }
 0x240   :  { %765 = vmatprep.subr.bf16.mxu0 %v1065_v12 }
 0x243   :  { %767 = vmatpush1.bf16.msra.mxu0 %v1068_v18 }
 0x244   :  { %769 = vmatprep.subr.bf16.mxu0 %v1071_v19 }
 0x247   :  { %771 = vmatpush1.bf16.msra.mxu0 %v1074_v26 }
 0x248   :  { %773 = vmatprep.subr.bf16.mxu0 %v1077_v27 }
 0x24b   :  { %775 = vmatpush1.bf16.msra.mxu0 %v1080_v34 }
 0x24c   :  { %777 = vmatprep.subr.bf16.mxu0 %v1083_v37 }
 0x24f   :  { %779 = vmatpush1.bf16.msra.mxu0 %v1086_v44 }
 0x250   :  { %781 = vmatprep.subr.bf16.mxu0 %v1089_v45 }
 0x253   :  { %783 = vmatpush1.bf16.msra.mxu0 %v1092_v52 }
 0x254   :  { %785 = vmatprep.subr.bf16.mxu0 %v1095_v53 }
 0x257   :  { %787 = vmatpush1.bf16.msra.mxu0 %v1098_v62 }
 0x258   :  { %789 = vmatprep.subr.bf16.mxu0 %v1101_v63 }
 0x25b   :  { %791 = vmatpush1.bf16.msra.mxu0 %v1104_v16 }
 0x25c   :  { %793 = vmatprep.subr.bf16.mxu0 %v1107_v17 }
 0x25f   :  { %795 = vmatpush1.bf16.msra.mxu0 %v1111_v24 }
 0x2f5   :  { %v452_v21 = vpop.f32.mrb[0].mxu0 }
 0x2f6   :  { %v454_v22 = vpop.f32.mrb[1].mxu0 }
 0x2f7   :  { %539 = vmatprep.mubr.f32.mxu0 %v454_v22  ;;  %v1231_v22 = vld [vmem:[#allocation13_spill] sm:$0xff] }
 0x2f8   :  { %540 = vmatmul.mubr.f32.vlgmr.msra.gmra.mrb[8].mxu0 %v452_v21  ;;  %v362_v21 = vadd.f32 %v1126_v5, %v1230_v15 }
 0x2f9   :  { %v458_v28 = vpop.f32.mrb[2].mxu0 }
 0x2fa   :  { %v460_v29 = vpop.f32.mrb[3].mxu0 }
 0x2fb   :  { %545 = vmatprep.mubr.f32.mxu0 %v460_v29 }
 0x2fc   :  { %546 = vmatmul.mubr.f32.gmra.mrb[10].mxu0 %v458_v28  ;;  %v364_v28 = vadd.f32 %v1128_v3, %v1231_v22 }
 0x2fd   :  { %v464_v35 = vpop.f32.mrb[4].mxu0 }
 0x2fe   :  { %v466_v36 = vpop.f32.mrb[5].mxu0 }
 0x2ff   :  { %551 = vmatprep.mubr.f32.mxu0 %v466_v36 }
 0x300   :  { %552 = vmatmul.mubr.f32.gmra.mrb[12].mxu0 %v464_v35 }
 0x301   :  { %v470_v42 = vpop.f32.mrb[6].mxu0 }
 0x302   :  { %v472_v43 = vpop.f32.mrb[7].mxu0 }
 0x303   :  { %557 = vmatprep.mubr.f32.mxu0 %v472_v43 }
 0x304   :  { %558 = vmatmul.mubr.f32.gmra.mrb[14].mxu0 %v470_v42 }
 0x3cb   :  { %v541_v48 = vpop.f32.mrb[8].mxu0 }
 0x3cc   :  { %v543_v49 = vpop.f32.mrb[9].mxu0  ;;  %v564_v55 = vmul.f32 %v541_v48, %v541_v48 }
 0x3cd   :  { %v565_v9 = vmul.f32 %v543_v49, %v543_v49 }
 0x3cf   :  { %v547_v54 = vpop.f32.mrb[10].mxu0 }
 0x3d0   :  { %v566_v60 = vmul.f32 %v547_v54, %v547_v54  ;;  %v549_v61 = vpop.f32.mrb[11].mxu0 }
 0x3d1   :  { %v567_v12 = vmul.f32 %v549_v61, %v549_v61 }
 0x3d2   :  { %v572_v18 = vadd.f32 %v566_v60, %v564_v55 }
 0x3d3   :  { %v581_v19 = vadd.f32 %v567_v12, %v565_v9  ;;  %v553_v26 = vpop.f32.mrb[12].mxu0 }
 0x3d4   :  { %v568_v27 = vmul.f32 %v553_v26, %v553_v26  ;;  %v555_v34 = vpop.f32.mrb[13].mxu0 }
 0x3d5   :  { %v569_v37 = vmul.f32 %v555_v34, %v555_v34 }
 0x3d6   :  { %v573_v44 = vadd.f32 %v572_v18, %v568_v27 }
 0x3d7   :  { %v582_v45 = vadd.f32 %v581_v19, %v569_v37  ;;  %v559_v52 = vpop.f32.mrb[14].mxu0 }
 0x3d8   :  { %v570_v53 = vmul.f32 %v559_v52, %v559_v52  ;;  %v561_v62 = vpop.f32.mrb[15].mxu0 }
 0x3d9   :  { %v571_v63 = vmul.f32 %v561_v62, %v561_v62 }
 0x3da   :  { %v574_v16 = vadd.f32 %v573_v44, %v570_v53 }
 0x3db   :  { %v583_v17 = vadd.f32 %v582_v45, %v571_v63 }
 0x3dc   :  { %v575_v24 = vrot.slane %v574_v16, 4 }
 0x3dd   :  { %v584_v30 = vrot.slane %v583_v17, 4 }
 0x3de   :  { %v576_v32 = vadd.f32 %v575_v24, %v574_v16 }
 0x3df   :  { %v585_v33 = vadd.f32 %v584_v30, %v583_v17 }
 0x3e0   :  { %v577_v38 = vrot.slane %v576_v32, 2 }
 0x3e1   :  { %v586_v39 = vrot.slane %v585_v33, 2 }
 0x3e2   :  { %v578_v40 = vadd.f32 %v577_v38, %v576_v32 }
 0x3e3   :  { %v587_v50 = vadd.f32 %v586_v39, %v585_v33 }
 0x3e4   :  { %v579_v51 = vrot.slane %v578_v40, 1 }
 0x3e5   :  { %v588_v57 = vrot.slane %v587_v50, 1 }
 0x3e6   :  { %v580_v58 = vadd.f32 %v579_v51, %v578_v40 }
 0x3e7   :  { %v589_v59 = vadd.f32 %v588_v57, %v587_v50 }
 0x3e8   :  { %v590_v4 = vmax.f32 %v580_v58, 1e-24 }
 0x3e9   :  { %v591_v13 = vmax.f32 %v589_v59, 1e-24 }
 0x3ea   :  { %809 = vrsqrt.f32 %v590_v4 }
 0x3eb   :  { %811 = vrsqrt.f32 %v591_v13 }
 0x3f4   :  { %v810_v56 = vpop.eup %809 }
 0x3f5   :  { %v812_v11 = vpop.eup %811  ;;  %v600_v25 = vmul.f32 %v810_v56, %v559_v52  ;;  %v594_v29 = vmul.f32 %v810_v56, %v541_v48  ;;  %v596_v1 = vmul.f32 %v810_v56, %v547_v54  ;;  %v598_v35 = vmul.f32 %v810_v56, %v553_v26 }
 0x3f6   :  { %v601_v36 = vmul.f32 %v812_v11, %v561_v62  ;;  %v595_v31 = vmul.f32 %v812_v11, %v543_v49  ;;  %v597_v42 = vmul.f32 %v812_v11, %v549_v61  ;;  %v599_v43 = vmul.f32 %v812_v11, %v555_v34 }
 0x3f7   :  { %v608_v55 = vadd.f32 %v600_v25, %v367_v6  ;;  %v602_v2 = vadd.f32 %v594_v29, %v361_v46  ;;  %v604_v60 = vadd.f32 %v596_v1, %v363_v23  ;;  %v606_v9 = vadd.f32 %v598_v35, %v365_v20 }
 0x3f8   :  { %v609_v5 = vadd.f32 %v601_v36, %v368_v14  ;;  %v603_v12 = vadd.f32 %v595_v31, %v362_v21  ;;  %v605_v18 = vadd.f32 %v597_v42, %v364_v28  ;;  %v607_v3 = vadd.f32 %v599_v43, %v366_v41 }
 0x3f9   :  { %v616_v0 = vmul.f32 0.33333334, %v608_v55  ;;  %v610_v19 = vmul.f32 0.33333334, %v602_v2  ;;  %v612_v27 = vmul.f32 0.33333334, %v604_v60 }
 0x3fa   :  { %v617_v48 = vmul.f32 0.33333334, %v609_v5  ;;  %v611_v54 = vmul.f32 0.33333334, %v603_v12  ;;  %v613_v26 = vmul.f32 0.33333334, %v605_v18 }
 0x3fb   :  { %624 = vst [vmem:[#allocation8 + $0x30] sm:$0xff] %v616_v0  ;;  %v614_v49 = vmul.f32 0.33333334, %v606_v9  ;;  %v615_v61 = vmul.f32 0.33333334, %v607_v3  ;;  %618 = vst [vmem:[#allocation8] sm:$0xff] %v610_v19 }
 0x3fc   :  { %620 = vst [vmem:[#allocation8 + $0x10] sm:$0xff] %v612_v27  ;;  %625 = vst [vmem:[#allocation8 + $0x38] sm:$0xff] %v617_v48 }
 0x3fd   :  { %619 = vst [vmem:[#allocation8 + $0x8] sm:$0xff] %v611_v54  ;;  %621 = vst [vmem:[#allocation8 + $0x18] sm:$0xff] %v613_v26 }
 0x3fe   :  { %622 = vst [vmem:[#allocation8 + $0x20] sm:$0xff] %v614_v49  ;;  %623 = vst [vmem:[#allocation8 + $0x28] sm:$0xff] %v615_v61 }
 0x3ff   :  { %890 = shalt.err (!%p887_p0)
}
 0x400   :  { %s891_s29 = scalar_lea.hbm %s1211_s3, 1024 }
 0x401   :  { %p892_p1 = scmp.ne.s32.totalorder %s1211_s3, %s891_s29  ;;  %p895_p2 = scmp.lt.u32.totalorder %s891_s29, %s1211_s3 }
 0x403   :  { %p897_p3 = pnand %p895_p2, %p892_p1 }
 0x405   :  { %900 = shalt.err (!%p897_p3)
}
 0x406   :  { %637 = dma.vmem_to_hbm [thread:$0]  %s632_s23, 1024, %s1211_s3, [#allocation4], %s909_s24, %s909_s24, %s910_s25  }
 0x407   :  { %905 = dma.done.wait [#allocation4], 1024  }
 0x408   :  { %906 = vsyncadd [#allocation4], 4294966272 }
 0x409   :  { %641 = vsyncpa [#allocation3], 1 }
 0x40a   :  { %642 = vsyncpa [#allocation6], 1 }
 0x40b   :  { %643 = vsyncpa [#allocation4], 1 }

</bundles_post_ra>
